<compile_context>
chip_gen: v5e
topology: v5e:2x2
jax: 0.10.0
libtpu: 0.0.40
codegen_flags: <defaults>
</compile_context>

<pallas_src>
import functools
import math

import jax
import jax.numpy as jnp
from jax.experimental import pallas as pl
from jax.experimental.pallas import tpu as pltpu  # noqa: F401  (TPU backend)


# ----------------------------- kernel ---------------------------------------


def _pos_enc_kernel(x_ref, pe_ref, o_ref, *, scale):
    """out = x * sqrt(embed) + positional_encoding (dropout = identity, eval)."""
    o_ref[...] = x_ref[...] * scale + pe_ref[...]


# ----------------------------- wrapper ---------------------------------------


def make_positional_encoding(seq_len, embed):
    """Faithful rebuild of the reference table:
       be[pos, i] = pos / 10000^(2*i/embed); sin on even cols, cos on odd cols."""
    pos = jnp.arange(seq_len, dtype=jnp.float32)[:, None]     # (S, 1)
    i = jnp.arange(embed, dtype=jnp.float32)[None, :]          # (1, E)
    be = pos / jnp.power(10000.0, 2.0 * i / embed)             # (S, E)
    be = be.at[:, 0::2].set(jnp.sin(be[:, 0::2]))
    be = be.at[:, 1::2].set(jnp.cos(be[:, 1::2]))
    return be


def positional_encoding_forward(x, be):
    """x: [B, S, E] float32; be: [S, E] float32 -> [B, S, E]."""
    B, S, E = x.shape
    assert be.shape == (S, E)
    scale = math.sqrt(E)

    # Lane-dense presentation: collapse (S, E) -> S*E on the last (lane) dim so
    # the output store is a full unmasked vst when S*E is a multiple of 128.
    if (S * E) % 128 == 0:
        x_in = x.reshape(B, S * E)
        pe_in = be.reshape(1, S * E)            # broadcasts over batch in-kernel
        out_shape = jax.ShapeDtypeStruct((B, S * E), x.dtype)
    else:
        x_in = x
        pe_in = be[None]                        # (1, S, E), broadcasts over batch
        out_shape = jax.ShapeDtypeStruct((B, S, E), x.dtype)

    flops = 2 * B * S * E                       # one mul + one add per element
    bytes_accessed = 4 * (2 * B * S * E + S * E)

    out = pl.pallas_call(
        functools.partial(_pos_enc_kernel, scale=scale),
        out_shape=out_shape,
        cost_estimate=pl.CostEstimate(
            flops=flops, transcendentals=0, bytes_accessed=bytes_accessed),
    )(x_in, pe_in)

    # TODO(synk): nn.Dropout is stochastic in train mode; eval semantics
    # (identity) are implemented here.
    return out.reshape(B, S, E)


# ----------------------------- reference ------------------------------------


def positional_encoding_reference(x, be):
    return x * math.sqrt(x.shape[-1]) + be


# ----------------------------- main ------------------------------------------


if __name__ == "__main__":
    B, S, E = 2, 8, 32                          # batch, sequence_length, embed
    key = jax.random.PRNGKey(0)
    x = jax.random.normal(key, (B, S, E), jnp.float32)
    be = make_positional_encoding(S, E)

    out = positional_encoding_forward(x, be)
    out = jax.block_until_ready(out)

    ref = positional_encoding_reference(x, be)
    assert out.shape == (B, S, E)
    assert jnp.allclose(out, ref, atol=1e-5, rtol=1e-5), "mismatch vs reference"

    print("KERNEL_OK")
</pallas_src>

<mosaic_0001>
module attributes {stable_mosaic.version = 11 : i64} {
  func.func @_pos_enc_kernel(%arg0: memref<2x256xf32, #tpu.memory_space<vmem>>, %arg1: memref<1x256xf32, #tpu.memory_space<vmem>>, %arg2: memref<2x256xf32, #tpu.memory_space<vmem>>) attributes {dimension_semantics = [], scalar_prefetch = 0 : i64, scratch_operands = 0 : i64, tpu.core_type = #tpu.core_type<tc>} {
    %c0 = arith.constant 0 : index
    %c0_0 = arith.constant 0 : index
    %0 = vector.load %arg0[%c0, %c0_0] : memref<2x256xf32, #tpu.memory_space<vmem>>, vector<2x256xf32>
    %cst = arith.constant 5.65685415 : f32
    %1 = vector.broadcast %cst : f32 to vector<2x256xf32>
    %2 = arith.mulf %0, %1 : vector<2x256xf32>
    %c0_1 = arith.constant 0 : index
    %c0_2 = arith.constant 0 : index
    %3 = vector.load %arg1[%c0_1, %c0_2] : memref<1x256xf32, #tpu.memory_space<vmem>>, vector<1x256xf32>
    %4 = vector.broadcast %3 : vector<1x256xf32> to vector<2x256xf32>
    %5 = arith.addf %2, %4 : vector<2x256xf32>
    %c0_3 = arith.constant 0 : index
    %c0_4 = arith.constant 0 : index
    %6 = vector.load %arg2[%c0_3, %c0_4] : memref<2x256xf32, #tpu.memory_space<vmem>>, vector<2x256xf32>
    tpu.vector_store %arg2[%c0_3, %c0_4], %5 {strides = array<i32>} : memref<2x256xf32, #tpu.memory_space<vmem>>, vector<2x256xf32>,
    return
  }
}

</mosaic_0001>

<bundles_post_ra>
// kernel: tpu_custom_call.1
= control target key start
LH: loop header
LB: loop body
LE: loop exit
PB: predicated region body
PF: predicated region fallthrough
CT: control target
= control target key end

     0   :  { %7 = vsyncpa [#allocation3], 0  ;;  %s178_s0 = inlined_call_operand.hbm [shape: f32[2,256], index: 0, kind: input, shape index: {}]   ;;  %s179_s1 = inlined_call_operand.hbm [shape: f32[1,256], index: 1, kind: input, shape index: {}]   ;;  %s180_s2 = inlined_call_operand.hbm [shape: f32[2,256], index: 2, kind: output, shape index: {}]  }
   0x1   :  { %8 = vsyncpa [#allocation6], 0 }
   0x2   :  { %9 = vsyncpa [#allocation4], 0  ;;  %s15_s11 = sshll.u32 %s178_s0, 4  ;;  %s151_s12 = smov [#allocation2]   ;;  %s16_s11 = int_to_ptr.hbm [resolvable:$true] %s15_s11 }
   0x3   :  { %s17_s13 = sshll.u32 %s151_s12, 4  ;;  %s26_s16 = sshll.u32 %s179_s1, 4  ;;  %s18_s13 = int_to_ptr.vmem [resolvable:$true] %s17_s13  ;;  %s27_s16 = int_to_ptr.hbm [resolvable:$true] %s26_s16 }
   0x4   :  { %20 = dma.hbm_to_vmem [thread:$0]  %s16_s11, 64, %s18_s13, [#allocation3]  }
   0x5   :  { %s152_s17 = smov [#allocation5]  }
   0x6   :  { %s28_s18 = sshll.u32 %s152_s17, 4  ;;  %s29_s18 = int_to_ptr.vmem [resolvable:$true] %s28_s18 }
   0x7   :  { %31 = dma.hbm_to_vmem [thread:$0]  %s27_s16, 32, %s29_s18, [#allocation6]  }
   0x8   :  { %145 = dma.done.wait [#allocation3], 64  }
   0x9   :  { %146 = vsyncadd [#allocation3], 4294967232 }
   0xa   :  { %147 = dma.done.wait [#allocation6], 32  }
   0xb   :  { %148 = vsyncadd [#allocation6], 4294967264  ;;  %v40_v0 = vld [vmem:[#allocation2] sm:$0xf]  ;;  %v42_v1 = vld [vmem:[#allocation5] sm:$0x3] }
   0xc   :  { %v44_v2 = vperm.slane %v42_v1, 0  ;;  %v45_v3 = vperm.slane %v42_v1, 1  ;;  %v41_v4 = vmul.f32 5.656854, %v40_v0  ;;  %vm47_vm0 = vcmask 1041408   ;;  %s153_s0 = smov [#allocation7]  }
   0xd   :  { %s57_s19 = sshll.u32 %s153_s0, 4  ;;  %s59_s21 = sshll.u32 %s180_s2, 4  ;;  %s58_s19 = int_to_ptr.vmem [resolvable:$true] %s57_s19  ;;  %s60_s21 = int_to_ptr.hbm [resolvable:$true] %s59_s21 }
   0xe   :  { %v46_v5 = vrot.slane %v45_v3, 6 }
  0x10   :  { %v48_v6 = vsel %vm47_vm0, %v44_v2, %v46_v5 }
  0x11   :  { %v50_v7 = vadd.f32 %v48_v6, %v41_v4 }
  0x13   :  { %51 = vst [vmem:[#allocation7] sm:$0xf] %v50_v7 }
  0x14   :  { %62 = dma.vmem_to_hbm [thread:$0]  %s58_s19, 64, %s60_s21, [#allocation4]  }
  0x15   :  { %149 = dma.done.wait [#allocation4], 64  }
  0x16   :  { %150 = vsyncadd [#allocation4], 4294967232 }
  0x17   :  { %67 = vsyncpa [#allocation3], 1 }
  0x18   :  { %68 = vsyncpa [#allocation6], 1 }
  0x19   :  { %69 = vsyncpa [#allocation4], 1 }

</bundles_post_ra>
